<compile_context>
chip_gen: v5e
topology: v5e:2x2
jax: 0.10.0
libtpu: 0.0.40
codegen_flags: <defaults>
</compile_context>

<pallas_src>
import functools

import jax
import jax.numpy as jnp
from jax.experimental import pallas as pl
from jax.experimental.pallas import tpu as pltpu

_HALO = 128  # lane-aligned halo block for the conv overlap (covers K-1 extra columns)


def _conv_tile(x_ref, xh_ref, w_ref, K, TL):
    """One conv tile: (C_out, TL) f32 via a single im2col matmul (f32 MXU accumulation)."""
    xm = x_ref[0]                                       # (C_in, TL), native dtype
    if K > 1:
        xh = xh_ref[0, :, :K - 1]                       # (C_in, K-1) halo columns
        x_win = jnp.concatenate([xm, xh], axis=-1)      # (C_in, TL + K - 1)
    else:
        x_win = xm
    # im2col LHS rows ordered (k, c) to match w2 = W.transpose(0,2,1).reshape(C_out, K*C_in)
    lhs = jnp.concatenate([x_win[:, k:k + TL] for k in range(K)], axis=0)  # (K*C_in, TL)
    return jnp.dot(w_ref[...], lhs, preferred_element_type=jnp.float32)    # (C_out, TL) f32


def _conv_stats_kernel(x_ref, xh_ref, w_ref, stats_ref, *, K, TL, L_out, num_tiles):
    """Pass 1: conv tile + per-channel sum / sum-of-squares accumulated across L tiles."""
    j = pl.program_id(1)
    conv = _conv_tile(x_ref, xh_ref, w_ref, K, TL)      # (C_out, TL) f32

    @pl.when(j == 0)
    def _():
        stats_ref[...] = jnp.zeros_like(stats_ref)

    def _accumulate(vals):
        s = jnp.sum(vals, axis=1, keepdims=True)                  # (C_out, 1)
        ss = jnp.sum(vals * vals, axis=1, keepdims=True)          # (C_out, 1)
        stats_ref[...] += jnp.concatenate([s, ss], axis=1)[None]  # (1, C_out, 2)

    rem = L_out - (num_tiles - 1) * TL                  # valid columns in the last tile
    if rem == TL:
        # L_out is a multiple of TL: no masking anywhere.
        _accumulate(conv)
    else:
        @pl.when(j != num_tiles - 1)
        def _():
            _accumulate(conv)

        @pl.when(j == num_tiles - 1)
        def _():
            col = jax.lax.broadcasted_iota(jnp.int32, conv.shape, 1)
            _accumulate(jnp.where(col < rem, conv, 0.0))


def _conv_bn_relu_kernel(x_ref, xh_ref, w_ref, scale_ref, shift_ref, o_ref, *, K, TL):
    """Pass 2: recompute conv tile, apply folded BN (scale/shift) + ReLU, store NCW."""
    conv = _conv_tile(x_ref, xh_ref, w_ref, K, TL)      # (C_out, TL) f32
    y = conv * scale_ref[...] + shift_ref[...]          # per-channel affine (f32)
    o_ref[...] = jnp.maximum(y, 0.0)[None].astype(o_ref.dtype)


def _pick_tile(L_out, C_in, C_out, itemsize):
    """Largest lane-dense L tile (<=1024) whose double-buffered working set fits a budget."""
    budget = 24 << 20  # conservative working-set budget; fits v5e/v6e/v7x scoped VMEM
    tl = min(-(-L_out // 128) * 128, 1024)
    while tl > 128:
        foot = (2 * (C_in * (tl + _HALO) + C_out * tl) * itemsize  # double-buffered x + out
                + 4 * C_out * tl)                                  # f32 conv temp
        if foot <= budget:
            break
        tl -= 128
    return tl


def basic_conv(x_ncw, weight_oik, gamma, beta, *, padding=1, eps=1e-5):
    """x_ncw: (B, C_in, L) PyTorch NCW layout. weight_oik: (C_out, C_in, K).
    Returns (B, C_out, L_out) like the PyTorch module (conv -> BN(train) -> ReLU)."""
    B, C_in, L = x_ncw.shape
    C_out, C_in_w, K = weight_oik.shape
    assert C_in_w == C_in, "groups != 1 not implemented"
    assert K <= _HALO + 1, "kernel_size exceeds the 128-lane halo block"
    L_out = L + 2 * padding - K + 1            # stride=1, dilation=1
    assert L_out >= 1

    dtype = x_ncw.dtype
    itemsize = jnp.dtype(dtype).itemsize
    TL = _pick_tile(L_out, C_in, C_out, itemsize)
    num_tiles = -(-L_out // TL)
    L_total = num_tiles * TL + _HALO           # padded input length (halo always in-bounds)

    # TODO(synk): the wrapper-side jnp.pad along L still costs one extra HBM pass over x;
    #             it could be folded in-kernel with manually DMA'd masked edge tiles.
    right = L_total - L - padding
    x_padded = jnp.pad(x_ncw, ((0, 0), (0, 0), (padding, right)))

    # Weight as a single (C_out, K*C_in) matrix, rows ordered (k, c) for the im2col LHS.
    w2 = jnp.transpose(weight_oik, (0, 2, 1)).reshape(C_out, K * C_in).astype(dtype)

    grid = (B, num_tiles)
    x_main_spec = pl.BlockSpec((1, C_in, TL), lambda b, j: (b, 0, j))
    x_halo_spec = pl.BlockSpec((1, C_in, _HALO),
                               lambda b, j: (b, 0, (j + 1) * (TL // _HALO)))
    w_spec = pl.BlockSpec((C_out, K * C_in), lambda b, j: (0, 0))

    # VMEM limit derived from the working set; capped at 48 MiB so it is safe on v7x
    # (64 MiB physical) while still raising the default 16/32 MiB scoped limit.
    foot = (2 * (C_in * (TL + _HALO) + C_out * TL) * itemsize
            + 4 * C_out * TL + C_out * K * C_in * itemsize)
    vmem_limit = int(min(48 << 20, max(32 << 20, 4 * foot)))

    # ---- Pass 1: conv + BatchNorm statistics accumulated in a resident block --------
    # stats[b, c, 0] = sum_l conv[b, c, l]; stats[b, c, 1] = sum_l conv[b, c, l]^2
    stats = pl.pallas_call(
        functools.partial(_conv_stats_kernel, K=K, TL=TL, L_out=L_out,
                          num_tiles=num_tiles),
        grid=grid,
        in_specs=[x_main_spec, x_halo_spec, w_spec],
        out_specs=pl.BlockSpec((1, C_out, 2), lambda b, j: (b, 0, 0)),
        out_shape=jax.ShapeDtypeStruct((B, C_out, 2), jnp.float32),
        compiler_params=pltpu.CompilerParams(
            # j accumulates into a resident output block -> "arbitrary"; B stays
            # "parallel" so v7x megacore still shards across batch.
            # TODO(synk): for B == 1 split the L-tile axis into an outer "parallel"
            #             x inner "arbitrary" pair to keep both v7x cores busy.
            dimension_semantics=("parallel", "arbitrary"),
            vmem_limit_bytes=vmem_limit),
    )(x_padded, x_padded, w2)

    # Tiny cross-batch reduction + folding BN into per-channel scale/shift (f32).
    # NOTE: var = E[x^2] - mean^2 kept in f32; clamp guards tiny negative cancellation.
    tot = jnp.sum(stats, axis=0)                             # (C_out, 2)
    n = float(B * L_out)
    mean = tot[:, 0] / n
    var = jnp.maximum(tot[:, 1] / n - mean * mean, 0.0)      # biased batch variance
    inv = jax.lax.rsqrt(var + eps)
    g32 = gamma.astype(jnp.float32)
    scale = (g32 * inv).reshape(C_out, 1)
    shift = (beta.astype(jnp.float32) - mean * g32 * inv).reshape(C_out, 1)

    # ---- Pass 2: conv (recomputed) + normalize + affine + ReLU, exact NCW output ----
    # TODO(synk): on v5e (lowest HBM BW) a cached-conv variant (pass 1 also writes the
    #             raw conv, pass 2 purely elementwise) wins when C_out <= ~2*C_in.
    out = pl.pallas_call(
        functools.partial(_conv_bn_relu_kernel, K=K, TL=TL),
        grid=grid,
        in_specs=[x_main_spec, x_halo_spec, w_spec,
                  pl.BlockSpec((C_out, 1), lambda b, j: (0, 0)),
                  pl.BlockSpec((C_out, 1), lambda b, j: (0, 0))],
        out_specs=pl.BlockSpec((1, C_out, TL), lambda b, j: (b, 0, j)),
        # Exact output shape: the partial last L block is masked by Pallas, so no
        # wrapper-side slice (and no garbage columns) remains.
        out_shape=jax.ShapeDtypeStruct((B, C_out, L_out), dtype),
        compiler_params=pltpu.CompilerParams(
            dimension_semantics=("parallel", "parallel"),
            vmem_limit_bytes=vmem_limit),
    )(x_padded, x_padded, w2, scale, shift)
    return out


def _reference(x_ncw, weight_oik, gamma, beta, padding=1):
    """Pure-JAX reference mirroring the PyTorch forward (BN in training mode)."""
    y = jax.lax.conv_general_dilated(
        x_ncw.astype(jnp.float32), weight_oik.astype(jnp.float32),
        window_strides=(1,), padding=[(padding, padding)],
        dimension_numbers=('NCH', 'OIH', 'NCH'))
    mean = jnp.mean(y, axis=(0, 2), keepdims=True)
    var = jnp.mean((y - mean) ** 2, axis=(0, 2), keepdims=True)
    y = (y - mean) * jax.lax.rsqrt(var + 1e-5)
    y = y * gamma.reshape(1, -1, 1) + beta.reshape(1, -1, 1)
    return jnp.maximum(y, 0.0)


if __name__ == "__main__":
    B, C_in, C_out, L, K, PAD = 2, 4, 8, 16, 3, 1

    key = jax.random.PRNGKey(0)
    k1, k2, k3, k4 = jax.random.split(key, 4)
    x = jax.random.normal(k1, (B, C_in, L), dtype=jnp.float32)
    weight = 0.2 * jax.random.normal(k2, (C_out, C_in, K), dtype=jnp.float32)
    gamma = 1.0 + 0.1 * jax.random.normal(k3, (C_out,), dtype=jnp.float32)
    beta = 0.1 * jax.random.normal(k4, (C_out,), dtype=jnp.float32)

    ref = _reference(x, weight, gamma, beta, padding=PAD)

    # f32 path: tight check against the f32 reference.
    out = basic_conv(x, weight, gamma, beta, padding=PAD)
    out = jax.block_until_ready(out)
    assert out.shape == (B, C_out, L)
    assert jnp.allclose(out, ref, atol=1e-4, rtol=1e-4), "f32 mismatch vs reference"

    # bf16 activations/weights (f32 accumulation in-kernel): looser tolerance.
    out_bf16 = basic_conv(x.astype(jnp.bfloat16), weight.astype(jnp.bfloat16),
                          gamma, beta, padding=PAD)
    out_bf16 = jax.block_until_ready(out_bf16)
    assert out_bf16.shape == (B, C_out, L)
    assert jnp.allclose(out_bf16.astype(jnp.float32), ref, atol=1e-1, rtol=1e-1), \
        "bf16 mismatch vs reference"

    print("KERNEL_OK")
</pallas_src>

<mosaic_0001>
module attributes {stable_mosaic.version = 11 : i64} {
  func.func @_conv_stats_kernel(%arg0: i32, %arg1: i32, %arg2: memref<1x4x128xf32, #tpu.memory_space<vmem>>, %arg3: memref<1x4x128xf32, #tpu.memory_space<vmem>>, %arg4: memref<8x12xf32, #tpu.memory_space<vmem>>, %arg5: memref<1x8x2xf32, #tpu.memory_space<vmem>>) attributes {dimension_semantics = [#tpu.dimension_semantics<parallel>, #tpu.dimension_semantics<arbitrary>], iteration_bounds = array<i64: 2, 1>, scalar_prefetch = 0 : i64, scratch_operands = 0 : i64, tpu.core_type = #tpu.core_type<tc>, window_params = [{transform_indices = @transform_0, window_bounds = array<i64: 1, 4, 128>}, {transform_indices = @transform_1, window_bounds = array<i64: 1, 4, 128>}, {pipeline_mode = #tpu.pipeline_mode<synchronous>, transform_indices = @transform_2, window_bounds = array<i64: 8, 12>}, {transform_indices = @transform_3, window_bounds = array<i64: 1, 8, 2>}]} {
    %c0 = arith.constant 0 : index
    %c0_0 = arith.constant 0 : index
    %c0_1 = arith.constant 0 : index
    %0 = vector.load %arg2[%c0, %c0_0, %c0_1] : memref<1x4x128xf32, #tpu.memory_space<vmem>>, vector<1x4x128xf32>
    %1 = vector.shape_cast %0 : vector<1x4x128xf32> to vector<4x128xf32>
    %c0_2 = arith.constant 0 : index
    %c0_3 = arith.constant 0 : index
    %c0_4 = arith.constant 0 : index
    %2 = vector.load %arg3[%c0_2, %c0_3, %c0_4] : memref<1x4x128xf32, #tpu.memory_space<vmem>>, vector<1x4x2xf32>
    %3 = vector.shape_cast %2 : vector<1x4x2xf32> to vector<4x2xf32>
    %4 = tpu.concatenate %1, %3 in 1 : vector<4x128xf32>, vector<4x2xf32> -> vector<4x130xf32>
    %5 = vector.extract_strided_slice %4 {offsets = [0, 0], sizes = [4, 128], strides = [1, 1]} : vector<4x130xf32> to vector<4x128xf32>
    %6 = vector.extract_strided_slice %4 {offsets = [0, 1], sizes = [4, 128], strides = [1, 1]} : vector<4x130xf32> to vector<4x128xf32>
    %7 = vector.extract_strided_slice %4 {offsets = [0, 2], sizes = [4, 128], strides = [1, 1]} : vector<4x130xf32> to vector<4x128xf32>
    %8 = tpu.concatenate %5, %6, %7 in 0 : vector<4x128xf32>, vector<4x128xf32>, vector<4x128xf32> -> vector<12x128xf32>
    %c0_5 = arith.constant 0 : index
    %c0_6 = arith.constant 0 : index
    %9 = vector.load %arg4[%c0_5, %c0_6] : memref<8x12xf32, #tpu.memory_space<vmem>>, vector<8x12xf32>
    %cst = arith.constant dense<0.000000e+00> : vector<8x128xf32>
    %10 = tpu.matmul %9, %8, %cst {dimension_numbers = #tpu.dot_dimension_numbers<[1], [0], [0], [1], [0, 0, 1, 1], [], []>} : vector<8x12xf32>, vector<12x128xf32>, vector<8x128xf32> -> vector<8x128xf32>
    %c0_i32 = arith.constant 0 : i32
    %11 = arith.cmpi eq, %arg1, %c0_i32 : i32
    %12 = arith.extui %11 : i1 to i32
    %c0_i32_7 = arith.constant 0 : i32
    %13 = arith.cmpi ne, %12, %c0_i32_7 : i32
    scf.if %13 {
      %cst_12 = arith.constant 0.000000e+00 : f32
      %20 = vector.broadcast %cst_12 : f32 to vector<1x8x2xf32>
      %c0_13 = arith.constant 0 : index
      %c0_14 = arith.constant 0 : index
      %c0_15 = arith.constant 0 : index
      %21 = vector.load %arg5[%c0_13, %c0_14, %c0_15] : memref<1x8x2xf32, #tpu.memory_space<vmem>>, vector<1x8x2xf32>
      tpu.vector_store %arg5[%c0_13, %c0_14, %c0_15], %20 {strides = array<i32>} : memref<1x8x2xf32, #tpu.memory_space<vmem>>, vector<1x8x2xf32>,
    } else {
    }
    %c0_i32_8 = arith.constant 0 : i32
    %14 = arith.cmpi ne, %arg1, %c0_i32_8 : i32
    %15 = arith.extui %14 : i1 to i32
    %c0_i32_9 = arith.constant 0 : i32
    %16 = arith.cmpi ne, %15, %c0_i32_9 : i32
    scf.if %16 {
      %cst_12 = arith.constant dense<0.000000e+00> : vector<8xf32>
      %20 = vector.multi_reduction <add>, %10, %cst_12 [1] : vector<8x128xf32> to vector<8xf32>
      %21 = vector.shape_cast %20 : vector<8xf32> to vector<8x1xf32>
      %22 = arith.mulf %10, %10 : vector<8x128xf32>
      %cst_13 = arith.constant dense<0.000000e+00> : vector<8xf32>
      %23 = vector.multi_reduction <add>, %22, %cst_13 [1] : vector<8x128xf32> to vector<8xf32>
      %24 = vector.shape_cast %23 : vector<8xf32> to vector<8x1xf32>
      %c0_14 = arith.constant 0 : index
      %c0_15 = arith.constant 0 : index
      %c0_16 = arith.constant 0 : index
      %25 = vector.load %arg5[%c0_14, %c0_15, %c0_16] : memref<1x8x2xf32, #tpu.memory_space<vmem>>, vector<1x8x2xf32>
      %26 = tpu.concatenate %21, %24 in 1 : vector<8x1xf32>, vector<8x1xf32> -> vector<8x2xf32>
      %27 = vector.shape_cast %26 : vector<8x2xf32> to vector<1x8x2xf32>
      %28 = arith.addf %25, %27 : vector<1x8x2xf32>
      %c0_17 = arith.constant 0 : index
      %c0_18 = arith.constant 0 : index
      %c0_19 = arith.constant 0 : index
      %29 = vector.load %arg5[%c0_17, %c0_18, %c0_19] : memref<1x8x2xf32, #tpu.memory_space<vmem>>, vector<1x8x2xf32>
      tpu.vector_store %arg5[%c0_17, %c0_18, %c0_19], %28 {strides = array<i32>} : memref<1x8x2xf32, #tpu.memory_space<vmem>>, vector<1x8x2xf32>,
    } else {
    }
    %c0_i32_10 = arith.constant 0 : i32
    %17 = arith.cmpi eq, %arg1, %c0_i32_10 : i32
    %18 = arith.extui %17 : i1 to i32
    %c0_i32_11 = arith.constant 0 : i32
    %19 = arith.cmpi ne, %18, %c0_i32_11 : i32
    scf.if %19 {
      %20 = tpu.iota {dimensions = array<i32: 1>} : vector<8x128xi32>
      %c16_i32 = arith.constant 16 : i32
      %21 = vector.broadcast %c16_i32 : i32 to vector<8x128xi32>
      %22 = arith.cmpi slt, %20, %21 : vector<8x128xi32>
      %cst_12 = arith.constant 0.000000e+00 : f32
      %23 = vector.broadcast %cst_12 : f32 to vector<8x128xf32>
      %24 = arith.select %22, %10, %23 : vector<8x128xi1>, vector<8x128xf32>
      %cst_13 = arith.constant dense<0.000000e+00> : vector<8xf32>
      %25 = vector.multi_reduction <add>, %24, %cst_13 [1] : vector<8x128xf32> to vector<8xf32>
      %26 = vector.shape_cast %25 : vector<8xf32> to vector<8x1xf32>
      %27 = arith.mulf %24, %24 : vector<8x128xf32>
      %cst_14 = arith.constant dense<0.000000e+00> : vector<8xf32>
      %28 = vector.multi_reduction <add>, %27, %cst_14 [1] : vector<8x128xf32> to vector<8xf32>
      %29 = vector.shape_cast %28 : vector<8xf32> to vector<8x1xf32>
      %c0_15 = arith.constant 0 : index
      %c0_16 = arith.constant 0 : index
      %c0_17 = arith.constant 0 : index
      %30 = vector.load %arg5[%c0_15, %c0_16, %c0_17] : memref<1x8x2xf32, #tpu.memory_space<vmem>>, vector<1x8x2xf32>
      %31 = tpu.concatenate %26, %29 in 1 : vector<8x1xf32>, vector<8x1xf32> -> vector<8x2xf32>
      %32 = vector.shape_cast %31 : vector<8x2xf32> to vector<1x8x2xf32>
      %33 = arith.addf %30, %32 : vector<1x8x2xf32>
      %c0_18 = arith.constant 0 : index
      %c0_19 = arith.constant 0 : index
      %c0_20 = arith.constant 0 : index
      %34 = vector.load %arg5[%c0_18, %c0_19, %c0_20] : memref<1x8x2xf32, #tpu.memory_space<vmem>>, vector<1x8x2xf32>
      tpu.vector_store %arg5[%c0_18, %c0_19, %c0_20], %33 {strides = array<i32>} : memref<1x8x2xf32, #tpu.memory_space<vmem>>, vector<1x8x2xf32>,
    } else {
    }
    return
  }
  func.func @transform_0(%arg0: i32, %arg1: i32) -> (i32, i32, i32) {
    %c0_i32 = arith.constant 0 : i32
    %c0_i32_0 = arith.constant 0 : i32
    return %arg0, %c0_i32, %arg1 : i32, i32, i32
  }
  func.func @transform_1(%arg0: i32, %arg1: i32) -> (i32, i32, i32) {
    %c1_i32 = arith.constant 1 : i32
    %0 = arith.addi %arg1, %c1_i32 : i32
    %c1_i32_0 = arith.constant 1 : i32
    %1 = arith.muli %0, %c1_i32_0 : i32
    %c0_i32 = arith.constant 0 : i32
    %c0_i32_1 = arith.constant 0 : i32
    return %arg0, %c0_i32, %1 : i32, i32, i32
  }
  func.func @transform_2(%arg0: i32, %arg1: i32) -> (i32, i32) {
    %c0_i32 = arith.constant 0 : i32
    %c0_i32_0 = arith.constant 0 : i32
    %c0_i32_1 = arith.constant 0 : i32
    return %c0_i32, %c0_i32_0 : i32, i32
  }
  func.func @transform_3(%arg0: i32, %arg1: i32) -> (i32, i32, i32) {
    %c0_i32 = arith.constant 0 : i32
    %c0_i32_0 = arith.constant 0 : i32
    %c0_i32_1 = arith.constant 0 : i32
    return %arg0, %c0_i32, %c0_i32_0 : i32, i32, i32
  }
}

</mosaic_0001>

<bundles_post_ra>
// kernel: tpu_custom_call.1
= control target key start
LH: loop header
LB: loop body
LE: loop exit
PB: predicated region body
PF: predicated region fallthrough
CT: control target
= control target key end

     0   :  { %s862_s0 = inlined_call_operand.hbm [shape: f32[2,4,256], index: 0, kind: input, shape index: {}]   ;;  %s863_s1 = inlined_call_operand.hbm [shape: f32[2,4,256], index: 1, kind: input, shape index: {}]   ;;  %s864_s2 = inlined_call_operand.hbm [shape: f32[8,12], index: 2, kind: input, shape index: {}]   ;;  %s865_s3 = inlined_call_operand.vmem [shape: f32[2,8,2], index: 3, kind: output, shape index: {}]  }
   0x1   :  { %867 = sst [smem:[#allocation10_spill]] %s864_s2 }
   0x2   :  { %8 = vsyncpa [#allocation3], 0 }
   0x3   :  { %10 = vsyncpa [#allocation3 + $0x1], 0 }
   0x4   :  { %11 = vsyncpa [#allocation5], 0 }
   0x5   :  { %13 = vsyncpa [#allocation5 + $0x1], 0  ;;  %s737_s12 = smov 0   ;;  %s739_s13 = smov 0  }
   0x6   :  { %s741_s14 = smov 0   ;;  %s743_s15 = smov 0  }
   0x7   :  { %s745_s16 = smov 0   ;;  %s747_s17 = smov 0  }
   0x8 LB: > { %s866_s18 = sadd.s32 4294967295, %s711_s17   ;;  %p53_p0 = scmp.ne.s32.totalorder %s695_s13, %s691_s12  ;;  %s711_s17 = sphi %s747_s17, %s19_s17   ;;  %s707_s16 = sphi %s745_s16, %s878_s16   ;;  %s703_s15 = sphi %s743_s15, %s877_s15   ;;  %s699_s14 = sphi %s741_s14, %s876_s14   ;;  %s695_s13 = sphi %s739_s13, %s875_s13   ;;  %s691_s12 = sphi %s737_s12, %s874_s12  }
   0x9   : > { %p769_p1 = scmp.eq.s32.totalorder %s866_s18, 0  ;;  %p464_p2 = scmp.ge.s32.totalorder %s711_s17, 1 }
   0xa   : > { %p141_p3 = scmp.lt.s32.totalorder %s711_s17, 3  ;;  %s870_s2 = sld [smem:[#allocation10_spill]] }
   0xb   : > { %p777_p4 = por %p769_p1, %p53_p0  ;;  %s713_s25 = smov [#allocation6]  }
   0xc   : > { %p784_p5 = pnand %p464_p2, %p141_p3  ;;  %s155_s26 = sshll.u32 %s713_s25, 4  ;;  %s156_s26 = int_to_ptr.vmem [resolvable:$true] %s155_s26 }
   0xd   : > { %s31_s27 = sadd.s32 1, %s707_s16  ;;  %s40_s28 = sadd.s32 1, %s699_s14 }
   0xe   : > { %p492_p6 = pneg %p784_p5  ;;  %p33_p8 = scmp.ge.s32.totalorder %s31_s27, 2 }
   0xf   : > { %p47_p9 = scmp.ne.s32.totalorder %s699_s14, %s695_s13  ;;  %p48_p10 = scmp.eq.s32.totalorder %s711_s17, 0 }
  0x10   : > { %s153_s23 = sshll.u32 %s870_s2, 4  ;;  %p493_p7 = pnand %p492_p6, %p769_p1  ;;  %s154_s23 = int_to_ptr.hbm [resolvable:$true] %s153_s23 }
  0x11   : > { %s880_s27 = smov (%p33_p8, %s31_s27), 0  ;;  %p799_p11 = por %p48_p10, %p47_p9 }
  0x12   : > { %495 = dma.hbm_to_vmem [thread:$0]  (!%p493_p7), %s154_s23, 128, %s156_s26, [#allocation5]  }
  0x13   : > { %p504_p12 = scmp.lt.s32.totalorder %s711_s17, 2  ;;  %s35_s30 = ssub.s32 %s707_s16, %s880_s27 }
  0x14   : > { %s166_s4 = sand.u32 1, %s699_s14   ;;  %p38_p13 = scmp.eq.s32.totalorder %s35_s30, 0 }
  0x15   : > { %s467_s5 = sshll.u32 %s166_s4, 2  ;;  %s482_s6 = sshll.u32 %s707_s16, 3 }
  0x16   : > { %s809_s7 = scalar_select %p38_p13, %s699_s14, %s40_s28  }
  0x17   : > { %s176_s10 = scalar_lea.hbm %s862_s0, %s482_s6  ;;  %s170_s12 = scalar_lea.vmem [#allocation2], %s467_s5 }
  0x18   : > { %s178_s11 = sshll.u32 %s176_s10, 4  ;;  %s180_s21 = sshll.u32 %s170_s12, 4  ;;  %s179_s11 = int_to_ptr.hbm [resolvable:$true] %s178_s11  ;;  %s181_s21 = int_to_ptr.vmem [resolvable:$true] %s180_s21 }
  0x19   : > { %p497_p0 = pnand %p504_p12, %p799_p11  ;;  %s390_s25 = scalar_lea.hbm %s863_s1, %s482_s6 }
  0x1a   : > { %s187_s26 = sand.u32 1, %s711_s17   ;;  %s167_s30 = scalar_lea.sflag [#allocation3], %s166_s4 }
  0x1b   : > { %499 = dma.hbm_to_vmem [thread:$0]  (!%p497_p0), %s179_s11, 64, %s181_s21, %s167_s30  }
  0x1c   : > { %s391_s28 = scalar_lea.hbm %s390_s25, 4  ;;  %s191_s18 = scalar_lea.vmem [#allocation4], %s467_s5 }
  0x1d   : > { %s202_s2 = sshll.u32 %s191_s18, 4  ;;  %s200_s8 = sshll.u32 %s391_s28, 4  ;;  %s203_s2 = int_to_ptr.vmem [resolvable:$true] %s202_s2  ;;  %s201_s8 = int_to_ptr.hbm [resolvable:$true] %s200_s8 }
  0x1e   : > { %s188_s9 = scalar_lea.sflag [#allocation5], %s187_s26  ;;  %211 = sbr.rel (%p784_p5) target bundleno = 420 (0x1a4), region = 32 }
  0x1f   : > { %502 = dma.hbm_to_vmem [thread:$0]  (!%p497_p0), %s201_s8, 64, %s203_s2, %s188_s9  }
  0x20   : > { %s213_s29 = sand.u32 (!%p784_p5), 1, %s695_s13  }
  0x21   : > { %s474_s10 = sshll.u32 (!%p784_p5), %s213_s29, 2  ;;  %s214_s12 = scalar_lea.sflag (!%p784_p5), [#allocation3], %s213_s29 }
  0x22   : > { %s217_s6 = scalar_lea.vmem (!%p784_p5), [#allocation2], %s474_s10 }
  0x23   : > { %678 = dma.done.wait (%p777_p4), %s214_s12, 64  }
  0x24   : > { %680 = vsyncadd (%p777_p4), %s214_s12, 4294967232  ;;  %s873_s18 = sadd.s32 4294967295, %s711_s17   ;;  %s227_s2 = scalar_lea.vmem [#allocation4], %s474_s10 }
  0x25   : > { %s223_s4 = sand.u32 1, %s873_s18  }
  0x26   : > { %s224_s5 = scalar_lea.sflag [#allocation5], %s223_s4 }
  0x27   : > { %682 = dma.done.wait (%p777_p4), %s224_s5, 64  }
  0x28   : > { %684 = vsyncadd (%p777_p4), %s224_s5, 4294967232 }
  0x29   : > { %686 = dma.done.wait (%p769_p1), [#allocation5], 128  }
  0x2a   : > { %688 = vsyncadd (%p769_p1), [#allocation5], 4294967168  ;;  %v265_v0 = vld [vmem:[%s217_s6] sm:$0xf]  ;;  %v266_v1 = vld [vmem:[%s227_s2] sm:$0xf]  ;;  %v337_v14 = vlaneseq }
  0x2b   : > { %s714_s24 = smov 126   ;;  %v269_v2 = vrot.slane %v265_v0, 4  ;;  %v270_v3 = vrot.slane %v266_v1, 4  ;;  %s715_s11 = smov 127   ;;  %vm275_vm0 = vcmask 1039360   ;;  %vm282_vm1 = vcmask 1031168  }
  0x2c   : > { %278 = vrot.lane.b32.xlu0 %v265_v0, %s714_s24  ;;  %vm284_vm2 = vcmask 1043456   ;;  %v286_v13 = vld [vmem:[#allocation6] sm:$0xff]  ;;  %vm287_vm3 = vcmask 97280   ;;  %v338_v15 = vand.u32 127, %v337_v14  ;;  %p261_p1 = scmp.lt.s32.totalorder %s703_s15, 1  ;;  %vm317_vm5 = vcmask 15360  }
  0x2d   : > { %v558_v4 = vpack.i.bf16 %v270_v3, %v269_v2  ;;  %v716_v19 = vmov 0.0   ;;  %vm347_vm6 = vcmask 7168  }
  0x2e   : > { %vm339_vm4 = vcmp.lt.s32.totalorder %v338_v15, 16  ;;  %s882_s15 = smov (!%p261_p1, %s703_s15), 1 }
  0x2f   : > { %559 = vrot.lane.b32.xlu1 %v558_v4, %s715_s11  ;;  %s477_s19 = sshll.u32 %s882_s15, 3 }
  0x30   : > { %s264_s22 = scalar_lea.vmem %s865_s3, %s477_s19 }
  0x31   : > { %318 = vst.msk [vmem:[%s264_s22] sm:$0xff] %vm317_vm5, %v716_v19 }
  0x34   : > { %280 = vrot.lane.b32.xlu0 %v266_v1, %s714_s24 }
  0x38   : > { %v346_v20 = vld [vmem:[%s264_s22] sm:$0xff] }
  0x9e   : > { %v279_v5 = vpop.permute.xlu0 %278 }
  0xa1   : > { %v560_v6 = vpop.permute.xlu1 %559 }
  0xa2   : > { %v562_v7 = vunpack.i.h.bf16 %v560_v6  ;;  %v561_v8 = vunpack.i.l.bf16 %v560_v6 }
  0xa4   : > { %v276_v9 = vsel %vm275_vm0, %v561_v8, %v562_v7 }
  0xa5   : > { %v285_v12 = vsel %vm284_vm2, %v265_v0, %v276_v9 }
  0xa6   : > { %v281_v10 = vpop.permute.xlu0 %280 }
  0xa7   : > { %v283_v11 = vsel %vm282_vm1, %v279_v5, %v281_v10 }
  0xa8   : > { %478 = vmatpush.msk.msra.mxu0 %vm284_vm2, %v283_v11 }
  0xaa   : > { %308 = vmatpush.msra.mxu0 %v285_v12 }
  0xab   : > { %479 = vmatmul.msk.f32.vlgmr.msra.gmra.mxu0 %vm287_vm3, %v286_v13 }
 0x128   : > { %v310_v16 = vpop.f32.mrf.mxu0 }
 0x129   : > { %v340_v17 = vsel %vm339_vm4, %v310_v16, 0.0 }
 0x12a   : > { %341 = vadd.xlane.f32.xlu1 %v340_v17  ;;  %v343_v18 = vmul.f32 %v340_v17, %v340_v17 }
 0x12c   : > { %344 = vadd.xlane.f32.xlu2 %v343_v18 }
 0x19d   : > { %v342_v21 = vpop.xlane.xlu1 %341 }
 0x19f   : > { %v345_v22 = vpop.xlane.xlu2 %344 }
 0x1a0   : > { %v348_v23 = vsel %vm347_vm6, %v342_v21, %v345_v22 }
 0x1a1   : > { %v349_v24 = vadd.f32 %v348_v23, %v346_v20 }
 0x1a3   : > { %351 = vst.msk [vmem:[%s264_s22] sm:$0xff] %vm317_vm5, %v349_v24 }
 0x1a4 PF: > { %s19_s17 = sadd.s32 1, %s711_s17   ;;  %s874_s12 = smov %s695_s13 }
 0x1a5   : > { %p16_p2 = scmp.ge.s32.totalorder %s19_s17, 4   ;;  %s875_s13 = smov %s699_s14 }
 0x1a6   : > { %s876_s14 = smov %s809_s7  ;;  %s877_s15 = smov %s707_s16 }
 0x1a7   : > { %s878_s16 = smov %s880_s27  ;;  %18 = sbr.rel (!%p16_p2) target bundleno = 8 (0x8), region = 101 }
 0x1ac   :  { %371 = vsyncpa [#allocation3], 1 }
 0x1ad   :  { %373 = vsyncpa [#allocation3 + $0x1], 1 }
 0x1ae   :  { %374 = vsyncpa [#allocation5], 1 }
 0x1af   :  { %376 = vsyncpa [#allocation5 + $0x1], 1 }

</bundles_post_ra>
